<compile_context>
chip_gen: v5e
topology: v5e:2x2
jax: 0.10.0
libtpu: 0.0.40
codegen_flags: <defaults>
</compile_context>

<pallas_src>
import functools
import math

import jax
import jax.numpy as jnp
import numpy as np
from jax.experimental import pallas as pl
from jax.experimental.pallas import tpu as pltpu

EPS = 1e-5  # PyTorch nn.LayerNorm default
NEG_BIG = -1e30


def _layernorm(y, gamma, beta):
    mu = jnp.mean(y, axis=-1, keepdims=True)
    var = jnp.mean((y - mu) ** 2, axis=-1, keepdims=True)
    return (y - mu) * jax.lax.rsqrt(var + EPS) * gamma + beta


# ----------------------------------------------------------------------------- fused kernel

def _encoder_layer_kernel(enc_ref, tgt_ref, m1_ref, m2_ref, amask_ref,
                          wq_ref, bq_ref, wkv_ref, bkv_ref,
                          wfc_ref, bfc_ref, g1_ref, beta1_ref,
                          w1_ref, b1_ref, w2_ref, b2_ref, g2_ref, beta2_ref,
                          out_ref, attn_ref, *, n_head, d_k, d_v, inv_temp):
    # One batch element per grid step.
    tgt = tgt_ref[0]                      # (Lq, d_model)
    enc = enc_ref[0] * m1_ref[0]          # (Lk, d_model), enc_input * non_pad_mask1
    m2 = m2_ref[0]                        # (Lq, 1)
    masked = amask_ref[0] != 0            # (Lq, Lk)

    # --- projections (K and V fused into one lane-dense matmul) ---
    q = jnp.dot(tgt, wq_ref[...], preferred_element_type=jnp.float32) + bq_ref[...]
    kv = jnp.dot(enc, wkv_ref[...], preferred_element_type=jnp.float32) + bkv_ref[...]

    # --- multi-head scaled dot-product attention ---
    head_outs = []
    for h in range(n_head):
        qh = q[:, h * d_k:(h + 1) * d_k]                                   # (Lq, d_k)
        kh = kv[:, h * d_k:(h + 1) * d_k]                                  # (Lk, d_k)
        vh = kv[:, n_head * d_k + h * d_v: n_head * d_k + (h + 1) * d_v]   # (Lk, d_v)

        s = jnp.dot(qh, kh.T, preferred_element_type=jnp.float32) * inv_temp
        s = jnp.where(masked, NEG_BIG, s)                  # masked_fill(mask, -inf)
        mx = jnp.max(s, axis=-1, keepdims=True)
        e = jnp.exp(s - mx)
        p = e * pl.reciprocal(jnp.sum(e, axis=-1, keepdims=True), approx=True)
        attn_ref[0, h, :, :] = p
        head_outs.append(jnp.dot(p, vh, preferred_element_type=jnp.float32))

    heads = jnp.concatenate(head_outs, axis=-1)            # (Lq, H*d_v), final layout

    # --- fc -> +residual(tgt_output) -> LayerNorm -> * non_pad_mask2 ---
    y = jnp.dot(heads, wfc_ref[...], preferred_element_type=jnp.float32) + bfc_ref[...] + tgt
    att = _layernorm(y, g1_ref[...], beta1_ref[...]) * m2

    # --- PositionwiseFeedForward (conv1d k=1 == per-pos matmul) -> +res -> LN -> * mask2 ---
    hid = jnp.maximum(
        jnp.dot(att, w1_ref[...], preferred_element_type=jnp.float32) + b1_ref[...], 0.0)
    y2 = jnp.dot(hid, w2_ref[...], preferred_element_type=jnp.float32) + b2_ref[...] + att
    out_ref[0] = _layernorm(y2, g2_ref[...], beta2_ref[...]) * m2


def encoder_layer_c_forward(params, enc_input, tgt_output,
                            non_pad_mask1, non_pad_mask2, dec_enc_attn_mask):
    B, Lk, d_model = enc_input.shape
    _, Lq, _ = tgt_output.shape
    H, d_k, d_v = params["n_head"], params["d_k"], params["d_v"]
    d_inner = params["w1"].shape[1]

    # Fuse K / V projection weights so their output block is lane-dense.
    w_kv = jnp.concatenate([params["w_ks"], params["w_vs"]], axis=1)   # (d_model, H*(d_k+d_v))
    b_kv = jnp.concatenate([params["b_ks"], params["b_vs"]], axis=1)
    amask = dec_enc_attn_mask.astype(jnp.int32)

    kern = functools.partial(_encoder_layer_kernel, n_head=H, d_k=d_k, d_v=d_v,
                             inv_temp=1.0 / math.sqrt(d_k))

    def full2d(shape):
        return pl.BlockSpec(shape, lambda b: (0, 0))

    out, attn = pl.pallas_call(
        kern,
        out_shape=(
            jax.ShapeDtypeStruct((B, Lq, d_model), jnp.float32),
            jax.ShapeDtypeStruct((B, H, Lq, Lk), jnp.float32),
        ),
        grid=(B,),
        in_specs=[
            pl.BlockSpec((1, Lk, d_model), lambda b: (b, 0, 0)),   # enc_input
            pl.BlockSpec((1, Lq, d_model), lambda b: (b, 0, 0)),   # tgt_output
            pl.BlockSpec((1, Lk, 1), lambda b: (b, 0, 0)),         # non_pad_mask1
            pl.BlockSpec((1, Lq, 1), lambda b: (b, 0, 0)),         # non_pad_mask2
            pl.BlockSpec((1, Lq, Lk), lambda b: (b, 0, 0)),        # dec_enc_attn_mask
            full2d((d_model, H * d_k)),          # w_qs
            full2d((1, H * d_k)),                # b_qs
            full2d((d_model, H * (d_k + d_v))),  # w_kv (fused)
            full2d((1, H * (d_k + d_v))),        # b_kv (fused)
            full2d((H * d_v, d_model)),          # w_fc
            full2d((1, d_model)),                # b_fc
            full2d((1, d_model)),                # ln1_g
            full2d((1, d_model)),                # ln1_b
            full2d((d_model, d_inner)),          # w1
            full2d((1, d_inner)),                # b1
            full2d((d_inner, d_model)),          # w2
            full2d((1, d_model)),                # b2
            full2d((1, d_model)),                # ln2_g
            full2d((1, d_model)),                # ln2_b
        ],
        out_specs=(
            pl.BlockSpec((1, Lq, d_model), lambda b: (b, 0, 0)),
            pl.BlockSpec((1, H, Lq, Lk), lambda b: (b, 0, 0, 0)),
        ),
        compiler_params=pltpu.CompilerParams(dimension_semantics=("parallel",)),
    )(enc_input, tgt_output, non_pad_mask1, non_pad_mask2, amask,
      params["w_qs"], params["b_qs"], w_kv, b_kv,
      params["w_fc"], params["b_fc"], params["ln1_g"], params["ln1_b"],
      params["w1"], params["b1"], params["w2"], params["b2"],
      params["ln2_g"], params["ln2_b"])

    enc_slf_attn = None
    return out, enc_slf_attn, attn


# ----------------------------------------------------------------------------- reference (pure JAX)

def reference_forward(params, enc_input, tgt_output, m1, m2, attn_mask):
    B, Lk, d = enc_input.shape
    _, Lq, _ = tgt_output.shape
    H, d_k, d_v = params["n_head"], params["d_k"], params["d_v"]

    enc = enc_input * m1
    q = tgt_output.reshape(B * Lq, d) @ params["w_qs"] + params["b_qs"]
    k = enc.reshape(B * Lk, d) @ params["w_ks"] + params["b_ks"]
    v = enc.reshape(B * Lk, d) @ params["w_vs"] + params["b_vs"]
    q = q.reshape(B, Lq, H, d_k).transpose(0, 2, 1, 3)
    k = k.reshape(B, Lk, H, d_k).transpose(0, 2, 1, 3)
    v = v.reshape(B, Lk, H, d_v).transpose(0, 2, 1, 3)
    s = jnp.einsum("bhqd,bhkd->bhqk", q, k) / math.sqrt(d_k)
    s = jnp.where(attn_mask[:, None] != 0, NEG_BIG, s)
    p = jax.nn.softmax(s, axis=-1)
    o = jnp.einsum("bhqk,bhkd->bhqd", p, v).transpose(0, 2, 1, 3).reshape(B, Lq, H * d_v)
    o = o @ params["w_fc"] + params["b_fc"]

    def ln(x, g, b):
        mu = x.mean(-1, keepdims=True)
        var = ((x - mu) ** 2).mean(-1, keepdims=True)
        return (x - mu) / jnp.sqrt(var + EPS) * g + b

    att = ln(o + tgt_output, params["ln1_g"], params["ln1_b"]) * m2
    h = jax.nn.relu(att @ params["w1"] + params["b1"])
    y = h @ params["w2"] + params["b2"]
    out = ln(y + att, params["ln2_g"], params["ln2_b"]) * m2
    return out, p


# ----------------------------------------------------------------------------- main

if __name__ == "__main__":
    B, Lq, Lk = 2, 8, 16
    d_model, d_inner, n_head, d_k, d_v = 32, 64, 2, 16, 16

    root = jax.random.PRNGKey(0)
    keys = jax.random.split(root, 12)

    def init(key, shape, scale=0.1):
        return (scale * jax.random.normal(key, shape)).astype(jnp.float32)

    params = {
        "n_head": n_head, "d_k": d_k, "d_v": d_v,
        "w_qs": init(keys[0], (d_model, n_head * d_k)), "b_qs": init(keys[1], (1, n_head * d_k)),
        "w_ks": init(keys[2], (d_model, n_head * d_k)), "b_ks": init(keys[3], (1, n_head * d_k)),
        "w_vs": init(keys[4], (d_model, n_head * d_v)), "b_vs": init(keys[5], (1, n_head * d_v)),
        "w_fc": init(keys[6], (n_head * d_v, d_model)), "b_fc": init(keys[7], (1, d_model)),
        "w1": init(keys[8], (d_model, d_inner)), "b1": init(keys[9], (1, d_inner)),
        "w2": init(keys[10], (d_inner, d_model)), "b2": init(keys[11], (1, d_model)),
        "ln1_g": jnp.ones((1, d_model), jnp.float32), "ln1_b": jnp.zeros((1, d_model), jnp.float32),
        "ln2_g": jnp.ones((1, d_model), jnp.float32), "ln2_b": jnp.zeros((1, d_model), jnp.float32),
    }

    dkeys = jax.random.split(jax.random.PRNGKey(1), 2)
    enc_input = jax.random.normal(dkeys[0], (B, Lk, d_model), jnp.float32)
    tgt_output = jax.random.normal(dkeys[1], (B, Lq, d_model), jnp.float32)

    # non-pad masks (1 = keep, 0 = pad); attention mask (1 = masked), derived from key padding.
    valid_k = (jnp.arange(Lk)[None, :] < jnp.array([Lk, Lk - 5])[:, None]).astype(jnp.float32)
    valid_q = (jnp.arange(Lq)[None, :] < jnp.array([Lq, Lq - 2])[:, None]).astype(jnp.float32)
    non_pad_mask1 = valid_k[:, :, None]                       # (B, Lk, 1)
    non_pad_mask2 = valid_q[:, :, None]                       # (B, Lq, 1)
    dec_enc_attn_mask = jnp.broadcast_to((valid_k == 0)[:, None, :], (B, Lq, Lk)).astype(jnp.int32)

    enc_out, enc_slf_attn, enc_tgt_attn = encoder_layer_c_forward(
        params, enc_input, tgt_output, non_pad_mask1, non_pad_mask2, dec_enc_attn_mask)
    enc_out = jax.block_until_ready(enc_out)
    enc_tgt_attn = jax.block_until_ready(enc_tgt_attn)

    ref_out, ref_attn = reference_forward(
        params, enc_input, tgt_output, non_pad_mask1, non_pad_mask2, dec_enc_attn_mask)

    # Tolerance accounts for the approximate (EUP) reciprocal in the softmax denominator.
    np.testing.assert_allclose(np.asarray(enc_out), np.asarray(ref_out), rtol=2e-3, atol=2e-3)
    np.testing.assert_allclose(np.asarray(enc_tgt_attn), np.asarray(ref_attn), rtol=2e-3, atol=2e-3)
    assert enc_slf_attn is None
    assert enc_out.shape == (B, Lq, d_model) and enc_tgt_attn.shape == (B, n_head, Lq, Lk)

    print("KERNEL_OK")
</pallas_src>

<mosaic_0001>
module attributes {stable_mosaic.version = 11 : i64} {
  func.func @_encoder_layer_kernel(%arg0: i32, %arg1: memref<1x16x32xf32, #tpu.memory_space<vmem>>, %arg2: memref<1x8x32xf32, #tpu.memory_space<vmem>>, %arg3: memref<1x16x1xf32, #tpu.memory_space<vmem>>, %arg4: memref<1x8x1xf32, #tpu.memory_space<vmem>>, %arg5: memref<1x8x16xi32, #tpu.memory_space<vmem>>, %arg6: memref<32x32xf32, #tpu.memory_space<vmem>>, %arg7: memref<1x32xf32, #tpu.memory_space<vmem>>, %arg8: memref<32x64xf32, #tpu.memory_space<vmem>>, %arg9: memref<1x64xf32, #tpu.memory_space<vmem>>, %arg10: memref<32x32xf32, #tpu.memory_space<vmem>>, %arg11: memref<1x32xf32, #tpu.memory_space<vmem>>, %arg12: memref<1x32xf32, #tpu.memory_space<vmem>>, %arg13: memref<1x32xf32, #tpu.memory_space<vmem>>, %arg14: memref<32x64xf32, #tpu.memory_space<vmem>>, %arg15: memref<1x64xf32, #tpu.memory_space<vmem>>, %arg16: memref<64x32xf32, #tpu.memory_space<vmem>>, %arg17: memref<1x32xf32, #tpu.memory_space<vmem>>, %arg18: memref<1x32xf32, #tpu.memory_space<vmem>>, %arg19: memref<1x32xf32, #tpu.memory_space<vmem>>, %arg20: memref<1x8x32xf32, #tpu.memory_space<vmem>>, %arg21: memref<1x2x8x16xf32, #tpu.memory_space<vmem>>) attributes {dimension_semantics = [#tpu.dimension_semantics<parallel>], iteration_bounds = array<i64: 2>, scalar_prefetch = 0 : i64, scratch_operands = 0 : i64, tpu.core_type = #tpu.core_type<tc>, window_params = [{transform_indices = @transform_0, window_bounds = array<i64: 1, 16, 32>}, {transform_indices = @transform_1, window_bounds = array<i64: 1, 8, 32>}, {transform_indices = @transform_2, window_bounds = array<i64: 1, 16, 1>}, {transform_indices = @transform_3, window_bounds = array<i64: 1, 8, 1>}, {transform_indices = @transform_4, window_bounds = array<i64: 1, 8, 16>}, {pipeline_mode = #tpu.pipeline_mode<synchronous>, transform_indices = @transform_5, window_bounds = array<i64: 32, 32>}, {pipeline_mode = #tpu.pipeline_mode<synchronous>, transform_indices = @transform_6, window_bounds = array<i64: 1, 32>}, {pipeline_mode = #tpu.pipeline_mode<synchronous>, transform_indices = @transform_7, window_bounds = array<i64: 32, 64>}, {pipeline_mode = #tpu.pipeline_mode<synchronous>, transform_indices = @transform_8, window_bounds = array<i64: 1, 64>}, {pipeline_mode = #tpu.pipeline_mode<synchronous>, transform_indices = @transform_9, window_bounds = array<i64: 32, 32>}, {pipeline_mode = #tpu.pipeline_mode<synchronous>, transform_indices = @transform_10, window_bounds = array<i64: 1, 32>}, {pipeline_mode = #tpu.pipeline_mode<synchronous>, transform_indices = @transform_11, window_bounds = array<i64: 1, 32>}, {pipeline_mode = #tpu.pipeline_mode<synchronous>, transform_indices = @transform_12, window_bounds = array<i64: 1, 32>}, {pipeline_mode = #tpu.pipeline_mode<synchronous>, transform_indices = @transform_13, window_bounds = array<i64: 32, 64>}, {pipeline_mode = #tpu.pipeline_mode<synchronous>, transform_indices = @transform_14, window_bounds = array<i64: 1, 64>}, {pipeline_mode = #tpu.pipeline_mode<synchronous>, transform_indices = @transform_15, window_bounds = array<i64: 64, 32>}, {pipeline_mode = #tpu.pipeline_mode<synchronous>, transform_indices = @transform_16, window_bounds = array<i64: 1, 32>}, {pipeline_mode = #tpu.pipeline_mode<synchronous>, transform_indices = @transform_17, window_bounds = array<i64: 1, 32>}, {pipeline_mode = #tpu.pipeline_mode<synchronous>, transform_indices = @transform_18, window_bounds = array<i64: 1, 32>}, {transform_indices = @transform_19, window_bounds = array<i64: 1, 8, 32>}, {transform_indices = @transform_20, window_bounds = array<i64: 1, 2, 8, 16>}]} {
    %c0 = arith.constant 0 : index
    %c0_0 = arith.constant 0 : index
    %c0_1 = arith.constant 0 : index
    %0 = vector.load %arg2[%c0, %c0_0, %c0_1] : memref<1x8x32xf32, #tpu.memory_space<vmem>>, vector<1x8x32xf32>
    %1 = vector.shape_cast %0 : vector<1x8x32xf32> to vector<8x32xf32>
    %c0_2 = arith.constant 0 : index
    %c0_3 = arith.constant 0 : index
    %c0_4 = arith.constant 0 : index
    %2 = vector.load %arg1[%c0_2, %c0_3, %c0_4] : memref<1x16x32xf32, #tpu.memory_space<vmem>>, vector<1x16x32xf32>
    %3 = vector.shape_cast %2 : vector<1x16x32xf32> to vector<16x32xf32>
    %c0_5 = arith.constant 0 : index
    %c0_6 = arith.constant 0 : index
    %c0_7 = arith.constant 0 : index
    %4 = vector.load %arg3[%c0_5, %c0_6, %c0_7] : memref<1x16x1xf32, #tpu.memory_space<vmem>>, vector<1x16x1xf32>
    %5 = vector.shape_cast %4 : vector<1x16x1xf32> to vector<16x1xf32>
    %6 = vector.broadcast %5 : vector<16x1xf32> to vector<16x32xf32>
    %7 = arith.mulf %3, %6 : vector<16x32xf32>
    %c0_8 = arith.constant 0 : index
    %c0_9 = arith.constant 0 : index
    %c0_10 = arith.constant 0 : index
    %8 = vector.load %arg4[%c0_8, %c0_9, %c0_10] : memref<1x8x1xf32, #tpu.memory_space<vmem>>, vector<1x8x1xf32>
    %9 = vector.shape_cast %8 : vector<1x8x1xf32> to vector<8x1xf32>
    %c0_11 = arith.constant 0 : index
    %c0_12 = arith.constant 0 : index
    %c0_13 = arith.constant 0 : index
    %10 = vector.load %arg5[%c0_11, %c0_12, %c0_13] : memref<1x8x16xi32, #tpu.memory_space<vmem>>, vector<1x8x16xi32>
    %11 = vector.shape_cast %10 : vector<1x8x16xi32> to vector<8x16xi32>
    %c0_i32 = arith.constant 0 : i32
    %12 = vector.broadcast %c0_i32 : i32 to vector<8x16xi32>
    %13 = arith.cmpi ne, %11, %12 : vector<8x16xi32>
    %c0_14 = arith.constant 0 : index
    %c0_15 = arith.constant 0 : index
    %14 = vector.load %arg6[%c0_14, %c0_15] : memref<32x32xf32, #tpu.memory_space<vmem>>, vector<32x32xf32>
    %cst = arith.constant dense<0.000000e+00> : vector<8x32xf32>
    %15 = tpu.matmul %1, %14, %cst {dimension_numbers = #tpu.dot_dimension_numbers<[1], [0], [0], [1], [0, 0, 1, 1], [], []>} : vector<8x32xf32>, vector<32x32xf32>, vector<8x32xf32> -> vector<8x32xf32>
    %c0_16 = arith.constant 0 : index
    %c0_17 = arith.constant 0 : index
    %16 = vector.load %arg7[%c0_16, %c0_17] : memref<1x32xf32, #tpu.memory_space<vmem>>, vector<1x32xf32>
    %17 = vector.broadcast %16 : vector<1x32xf32> to vector<8x32xf32>
    %18 = arith.addf %15, %17 : vector<8x32xf32>
    %c0_18 = arith.constant 0 : index
    %c0_19 = arith.constant 0 : index
    %19 = vector.load %arg8[%c0_18, %c0_19] : memref<32x64xf32, #tpu.memory_space<vmem>>, vector<32x64xf32>
    %cst_20 = arith.constant dense<0.000000e+00> : vector<16x64xf32>
    %20 = tpu.matmul %7, %19, %cst_20 {dimension_numbers = #tpu.dot_dimension_numbers<[1], [0], [0], [1], [0, 0, 1, 1], [], []>} : vector<16x32xf32>, vector<32x64xf32>, vector<16x64xf32> -> vector<16x64xf32>
    %c0_21 = arith.constant 0 : index
    %c0_22 = arith.constant 0 : index
    %21 = vector.load %arg9[%c0_21, %c0_22] : memref<1x64xf32, #tpu.memory_space<vmem>>, vector<1x64xf32>
    %22 = vector.broadcast %21 : vector<1x64xf32> to vector<16x64xf32>
    %23 = arith.addf %20, %22 : vector<16x64xf32>
    %24 = vector.extract_strided_slice %18 {offsets = [0, 0], sizes = [8, 16], strides = [1, 1]} : vector<8x32xf32> to vector<8x16xf32>
    %25 = vector.extract_strided_slice %23 {offsets = [0, 0], sizes = [16, 16], strides = [1, 1]} : vector<16x64xf32> to vector<16x16xf32>
    %26 = vector.extract_strided_slice %23 {offsets = [0, 32], sizes = [16, 16], strides = [1, 1]} : vector<16x64xf32> to vector<16x16xf32>
    %27 = tpu.transpose %25, [1, 0] : vector<16x16xf32> -> vector<16x16xf32>
    %cst_23 = arith.constant dense<0.000000e+00> : vector<8x16xf32>
    %28 = tpu.matmul %24, %27, %cst_23 {dimension_numbers = #tpu.dot_dimension_numbers<[1], [0], [0], [1], [0, 0, 1, 1], [], []>} : vector<8x16xf32>, vector<16x16xf32>, vector<8x16xf32> -> vector<8x16xf32>
    %cst_24 = arith.constant 2.500000e-01 : f32
    %29 = vector.broadcast %cst_24 : f32 to vector<8x16xf32>
    %30 = arith.mulf %28, %29 : vector<8x16xf32>
    %cst_25 = arith.constant -1.000000e+30 : f32
    %31 = vector.broadcast %cst_25 : f32 to vector<8x16xf32>
    %32 = arith.select %13, %31, %30 : vector<8x16xi1>, vector<8x16xf32>
    %cst_26 = arith.constant dense<0xFF800000> : vector<8xf32>
    %33 = vector.multi_reduction <maximumf>, %32, %cst_26 [1] : vector<8x16xf32> to vector<8xf32>
    %34 = vector.shape_cast %33 : vector<8xf32> to vector<8x1xf32>
    %35 = vector.broadcast %34 : vector<8x1xf32> to vector<8x16xf32>
    %36 = arith.subf %32, %35 : vector<8x16xf32>
    %37 = math.exp %36 : vector<8x16xf32>
    %cst_27 = arith.constant dense<0.000000e+00> : vector<8xf32>
    %38 = vector.multi_reduction <add>, %37, %cst_27 [1] : vector<8x16xf32> to vector<8xf32>
    %39 = vector.shape_cast %38 : vector<8xf32> to vector<8x1xf32>
    %40 = tpu.reciprocal %39 {approx = true} : vector<8x1xf32> -> vector<8x1xf32>
    %41 = vector.broadcast %40 : vector<8x1xf32> to vector<8x16xf32>
    %42 = arith.mulf %37, %41 : vector<8x16xf32>
    %c0_28 = arith.constant 0 : index
    %c0_29 = arith.constant 0 : index
    %c0_30 = arith.constant 0 : index
    %c0_31 = arith.constant 0 : index
    %43 = vector.load %arg21[%c0_28, %c0_29, %c0_30, %c0_31] : memref<1x2x8x16xf32, #tpu.memory_space<vmem>>, vector<1x1x8x16xf32>
    %44 = vector.shape_cast %43 : vector<1x1x8x16xf32> to vector<8x16xf32>
    %45 = vector.shape_cast %42 : vector<8x16xf32> to vector<1x1x8x16xf32>
    tpu.vector_store %arg21[%c0_28, %c0_29, %c0_30, %c0_31], %45 {strides = array<i32>} : memref<1x2x8x16xf32, #tpu.memory_space<vmem>>, vector<1x1x8x16xf32>,
    %cst_32 = arith.constant dense<0.000000e+00> : vector<8x16xf32>
    %46 = tpu.matmul %42, %26, %cst_32 {dimension_numbers = #tpu.dot_dimension_numbers<[1], [0], [0], [1], [0, 0, 1, 1], [], []>} : vector<8x16xf32>, vector<16x16xf32>, vector<8x16xf32> -> vector<8x16xf32>
    %47 = vector.extract_strided_slice %18 {offsets = [0, 16], sizes = [8, 16], strides = [1, 1]} : vector<8x32xf32> to vector<8x16xf32>
    %48 = vector.extract_strided_slice %23 {offsets = [0, 16], sizes = [16, 16], strides = [1, 1]} : vector<16x64xf32> to vector<16x16xf32>
    %49 = vector.extract_strided_slice %23 {offsets = [0, 48], sizes = [16, 16], strides = [1, 1]} : vector<16x64xf32> to vector<16x16xf32>
    %50 = tpu.transpose %48, [1, 0] : vector<16x16xf32> -> vector<16x16xf32>
    %cst_33 = arith.constant dense<0.000000e+00> : vector<8x16xf32>
    %51 = tpu.matmul %47, %50, %cst_33 {dimension_numbers = #tpu.dot_dimension_numbers<[1], [0], [0], [1], [0, 0, 1, 1], [], []>} : vector<8x16xf32>, vector<16x16xf32>, vector<8x16xf32> -> vector<8x16xf32>
    %cst_34 = arith.constant 2.500000e-01 : f32
    %52 = vector.broadcast %cst_34 : f32 to vector<8x16xf32>
    %53 = arith.mulf %51, %52 : vector<8x16xf32>
    %cst_35 = arith.constant -1.000000e+30 : f32
    %54 = vector.broadcast %cst_35 : f32 to vector<8x16xf32>
    %55 = arith.select %13, %54, %53 : vector<8x16xi1>, vector<8x16xf32>
    %cst_36 = arith.constant dense<0xFF800000> : vector<8xf32>
    %56 = vector.multi_reduction <maximumf>, %55, %cst_36 [1] : vector<8x16xf32> to vector<8xf32>
    %57 = vector.shape_cast %56 : vector<8xf32> to vector<8x1xf32>
    %58 = vector.broadcast %57 : vector<8x1xf32> to vector<8x16xf32>
    %59 = arith.subf %55, %58 : vector<8x16xf32>
    %60 = math.exp %59 : vector<8x16xf32>
    %cst_37 = arith.constant dense<0.000000e+00> : vector<8xf32>
    %61 = vector.multi_reduction <add>, %60, %cst_37 [1] : vector<8x16xf32> to vector<8xf32>
    %62 = vector.shape_cast %61 : vector<8xf32> to vector<8x1xf32>
    %63 = tpu.reciprocal %62 {approx = true} : vector<8x1xf32> -> vector<8x1xf32>
    %64 = vector.broadcast %63 : vector<8x1xf32> to vector<8x16xf32>
    %65 = arith.mulf %60, %64 : vector<8x16xf32>
    %c0_38 = arith.constant 0 : index
    %c1 = arith.constant 1 : index
    %c0_39 = arith.constant 0 : index
    %c0_40 = arith.constant 0 : index
    %66 = vector.load %arg21[%c0_38, %c1, %c0_39, %c0_40] : memref<1x2x8x16xf32, #tpu.memory_space<vmem>>, vector<1x1x8x16xf32>
    %67 = vector.shape_cast %66 : vector<1x1x8x16xf32> to vector<8x16xf32>
    %68 = vector.shape_cast %65 : vector<8x16xf32> to vector<1x1x8x16xf32>
    tpu.vector_store %arg21[%c0_38, %c1, %c0_39, %c0_40], %68 {strides = array<i32>} : memref<1x2x8x16xf32, #tpu.memory_space<vmem>>, vector<1x1x8x16xf32>,
    %cst_41 = arith.constant dense<0.000000e+00> : vector<8x16xf32>
    %69 = tpu.matmul %65, %49, %cst_41 {dimension_numbers = #tpu.dot_dimension_numbers<[1], [0], [0], [1], [0, 0, 1, 1], [], []>} : vector<8x16xf32>, vector<16x16xf32>, vector<8x16xf32> -> vector<8x16xf32>
    %70 = tpu.concatenate %46, %69 in 1 : vector<8x16xf32>, vector<8x16xf32> -> vector<8x32xf32>
    %c0_42 = arith.constant 0 : index
    %c0_43 = arith.constant 0 : index
    %71 = vector.load %arg10[%c0_42, %c0_43] : memref<32x32xf32, #tpu.memory_space<vmem>>, vector<32x32xf32>
    %cst_44 = arith.constant dense<0.000000e+00> : vector<8x32xf32>
    %72 = tpu.matmul %70, %71, %cst_44 {dimension_numbers = #tpu.dot_dimension_numbers<[1], [0], [0], [1], [0, 0, 1, 1], [], []>} : vector<8x32xf32>, vector<32x32xf32>, vector<8x32xf32> -> vector<8x32xf32>
    %c0_45 = arith.constant 0 : index
    %c0_46 = arith.constant 0 : index
    %73 = vector.load %arg11[%c0_45, %c0_46] : memref<1x32xf32, #tpu.memory_space<vmem>>, vector<1x32xf32>
    %74 = vector.broadcast %73 : vector<1x32xf32> to vector<8x32xf32>
    %75 = arith.addf %72, %74 : vector<8x32xf32>
    %76 = arith.addf %75, %1 : vector<8x32xf32>
    %c0_47 = arith.constant 0 : index
    %c0_48 = arith.constant 0 : index
    %77 = vector.load %arg12[%c0_47, %c0_48] : memref<1x32xf32, #tpu.memory_space<vmem>>, vector<1x32xf32>
    %c0_49 = arith.constant 0 : index
    %c0_50 = arith.constant 0 : index
    %78 = vector.load %arg13[%c0_49, %c0_50] : memref<1x32xf32, #tpu.memory_space<vmem>>, vector<1x32xf32>
    %cst_51 = arith.constant dense<0.000000e+00> : vector<8xf32>
    %79 = vector.multi_reduction <add>, %76, %cst_51 [1] : vector<8x32xf32> to vector<8xf32>
    %80 = vector.shape_cast %79 : vector<8xf32> to vector<8x1xf32>
    %cst_52 = arith.constant 3.200000e+01 : f32
    %81 = vector.broadcast %cst_52 : f32 to vector<8x1xf32>
    %82 = arith.divf %80, %81 : vector<8x1xf32>
    %83 = vector.broadcast %82 : vector<8x1xf32> to vector<8x32xf32>
    %84 = arith.subf %76, %83 : vector<8x32xf32>
    %85 = arith.mulf %84, %84 : vector<8x32xf32>
    %cst_53 = arith.constant dense<0.000000e+00> : vector<8xf32>
    %86 = vector.multi_reduction <add>, %85, %cst_53 [1] : vector<8x32xf32> to vector<8xf32>
    %87 = vector.shape_cast %86 : vector<8xf32> to vector<8x1xf32>
    %cst_54 = arith.constant 3.200000e+01 : f32
    %88 = vector.broadcast %cst_54 : f32 to vector<8x1xf32>
    %89 = arith.divf %87, %88 : vector<8x1xf32>
    %90 = vector.broadcast %82 : vector<8x1xf32> to vector<8x32xf32>
    %91 = arith.subf %76, %90 : vector<8x32xf32>
    %cst_55 = arith.constant 9.99999974E-6 : f32
    %92 = vector.broadcast %cst_55 : f32 to vector<8x1xf32>
    %93 = arith.addf %89, %92 : vector<8x1xf32>
    %94 = math.rsqrt %93 : vector<8x1xf32>
    %95 = vector.broadcast %94 : vector<8x1xf32> to vector<8x32xf32>
    %96 = arith.mulf %91, %95 : vector<8x32xf32>
    %97 = vector.broadcast %77 : vector<1x32xf32> to vector<8x32xf32>
    %98 = arith.mulf %96, %97 : vector<8x32xf32>
    %99 = vector.broadcast %78 : vector<1x32xf32> to vector<8x32xf32>
    %100 = arith.addf %98, %99 : vector<8x32xf32>
    %101 = vector.broadcast %9 : vector<8x1xf32> to vector<8x32xf32>
    %102 = arith.mulf %100, %101 : vector<8x32xf32>
    %c0_56 = arith.constant 0 : index
    %c0_57 = arith.constant 0 : index
    %103 = vector.load %arg14[%c0_56, %c0_57] : memref<32x64xf32, #tpu.memory_space<vmem>>, vector<32x64xf32>
    %cst_58 = arith.constant dense<0.000000e+00> : vector<8x64xf32>
    %104 = tpu.matmul %102, %103, %cst_58 {dimension_numbers = #tpu.dot_dimension_numbers<[1], [0], [0], [1], [0, 0, 1, 1], [], []>} : vector<8x32xf32>, vector<32x64xf32>, vector<8x64xf32> -> vector<8x64xf32>
    %c0_59 = arith.constant 0 : index
    %c0_60 = arith.constant 0 : index
    %105 = vector.load %arg15[%c0_59, %c0_60] : memref<1x64xf32, #tpu.memory_space<vmem>>, vector<1x64xf32>
    %106 = vector.broadcast %105 : vector<1x64xf32> to vector<8x64xf32>
    %107 = arith.addf %104, %106 : vector<8x64xf32>
    %cst_61 = arith.constant 0.000000e+00 : f32
    %108 = vector.broadcast %cst_61 : f32 to vector<8x64xf32>
    %109 = arith.maximumf %107, %108 : vector<8x64xf32>
    %c0_62 = arith.constant 0 : index
    %c0_63 = arith.constant 0 : index
    %110 = vector.load %arg16[%c0_62, %c0_63] : memref<64x32xf32, #tpu.memory_space<vmem>>, vector<64x32xf32>
    %cst_64 = arith.constant dense<0.000000e+00> : vector<8x32xf32>
    %111 = tpu.matmul %109, %110, %cst_64 {dimension_numbers = #tpu.dot_dimension_numbers<[1], [0], [0], [1], [0, 0, 1, 1], [], []>} : vector<8x64xf32>, vector<64x32xf32>, vector<8x32xf32> -> vector<8x32xf32>
    %c0_65 = arith.constant 0 : index
    %c0_66 = arith.constant 0 : index
    %112 = vector.load %arg17[%c0_65, %c0_66] : memref<1x32xf32, #tpu.memory_space<vmem>>, vector<1x32xf32>
    %113 = vector.broadcast %112 : vector<1x32xf32> to vector<8x32xf32>
    %114 = arith.addf %111, %113 : vector<8x32xf32>
    %115 = arith.addf %114, %102 : vector<8x32xf32>
    %c0_67 = arith.constant 0 : index
    %c0_68 = arith.constant 0 : index
    %116 = vector.load %arg18[%c0_67, %c0_68] : memref<1x32xf32, #tpu.memory_space<vmem>>, vector<1x32xf32>
    %c0_69 = arith.constant 0 : index
    %c0_70 = arith.constant 0 : index
    %117 = vector.load %arg19[%c0_69, %c0_70] : memref<1x32xf32, #tpu.memory_space<vmem>>, vector<1x32xf32>
    %cst_71 = arith.constant dense<0.000000e+00> : vector<8xf32>
    %118 = vector.multi_reduction <add>, %115, %cst_71 [1] : vector<8x32xf32> to vector<8xf32>
    %119 = vector.shape_cast %118 : vector<8xf32> to vector<8x1xf32>
    %cst_72 = arith.constant 3.200000e+01 : f32
    %120 = vector.broadcast %cst_72 : f32 to vector<8x1xf32>
    %121 = arith.divf %119, %120 : vector<8x1xf32>
    %122 = vector.broadcast %121 : vector<8x1xf32> to vector<8x32xf32>
    %123 = arith.subf %115, %122 : vector<8x32xf32>
    %124 = arith.mulf %123, %123 : vector<8x32xf32>
    %cst_73 = arith.constant dense<0.000000e+00> : vector<8xf32>
    %125 = vector.multi_reduction <add>, %124, %cst_73 [1] : vector<8x32xf32> to vector<8xf32>
    %126 = vector.shape_cast %125 : vector<8xf32> to vector<8x1xf32>
    %cst_74 = arith.constant 3.200000e+01 : f32
    %127 = vector.broadcast %cst_74 : f32 to vector<8x1xf32>
    %128 = arith.divf %126, %127 : vector<8x1xf32>
    %129 = vector.broadcast %121 : vector<8x1xf32> to vector<8x32xf32>
    %130 = arith.subf %115, %129 : vector<8x32xf32>
    %cst_75 = arith.constant 9.99999974E-6 : f32
    %131 = vector.broadcast %cst_75 : f32 to vector<8x1xf32>
    %132 = arith.addf %128, %131 : vector<8x1xf32>
    %133 = math.rsqrt %132 : vector<8x1xf32>
    %134 = vector.broadcast %133 : vector<8x1xf32> to vector<8x32xf32>
    %135 = arith.mulf %130, %134 : vector<8x32xf32>
    %136 = vector.broadcast %116 : vector<1x32xf32> to vector<8x32xf32>
    %137 = arith.mulf %135, %136 : vector<8x32xf32>
    %138 = vector.broadcast %117 : vector<1x32xf32> to vector<8x32xf32>
    %139 = arith.addf %137, %138 : vector<8x32xf32>
    %140 = vector.broadcast %9 : vector<8x1xf32> to vector<8x32xf32>
    %141 = arith.mulf %139, %140 : vector<8x32xf32>
    %c0_76 = arith.constant 0 : index
    %c0_77 = arith.constant 0 : index
    %c0_78 = arith.constant 0 : index
    %142 = vector.load %arg20[%c0_76, %c0_77, %c0_78] : memref<1x8x32xf32, #tpu.memory_space<vmem>>, vector<1x8x32xf32>
    %143 = vector.shape_cast %142 : vector<1x8x32xf32> to vector<8x32xf32>
    %144 = vector.shape_cast %141 : vector<8x32xf32> to vector<1x8x32xf32>
    tpu.vector_store %arg20[%c0_76, %c0_77, %c0_78], %144 {strides = array<i32>} : memref<1x8x32xf32, #tpu.memory_space<vmem>>, vector<1x8x32xf32>,
    return
  }
  func.func @transform_0(%arg0: i32) -> (i32, i32, i32) {
    %c0_i32 = arith.constant 0 : i32
    %c0_i32_0 = arith.constant 0 : i32
    %c0_i32_1 = arith.constant 0 : i32
    return %arg0, %c0_i32, %c0_i32_0 : i32, i32, i32
  }
  func.func @transform_1(%arg0: i32) -> (i32, i32, i32) {
    %c0_i32 = arith.constant 0 : i32
    %c0_i32_0 = arith.constant 0 : i32
    %c0_i32_1 = arith.constant 0 : i32
    return %arg0, %c0_i32, %c0_i32_0 : i32, i32, i32
  }
  func.func @transform_2(%arg0: i32) -> (i32, i32, i32) {
    %c0_i32 = arith.constant 0 : i32
    %c0_i32_0 = arith.constant 0 : i32
    %c0_i32_1 = arith.constant 0 : i32
    return %arg0, %c0_i32, %c0_i32_0 : i32, i32, i32
  }
  func.func @transform_3(%arg0: i32) -> (i32, i32, i32) {
    %c0_i32 = arith.constant 0 : i32
    %c0_i32_0 = arith.constant 0 : i32
    %c0_i32_1 = arith.constant 0 : i32
    return %arg0, %c0_i32, %c0_i32_0 : i32, i32, i32
  }
  func.func @transform_4(%arg0: i32) -> (i32, i32, i32) {
    %c0_i32 = arith.constant 0 : i32
    %c0_i32_0 = arith.constant 0 : i32
    %c0_i32_1 = arith.constant 0 : i32
    return %arg0, %c0_i32, %c0_i32_0 : i32, i32, i32
  }
  func.func @transform_5(%arg0: i32) -> (i32, i32) {
    %c0_i32 = arith.constant 0 : i32
    %c0_i32_0 = arith.constant 0 : i32
    %c0_i32_1 = arith.constant 0 : i32
    return %c0_i32, %c0_i32_0 : i32, i32
  }
  func.func @transform_6(%arg0: i32) -> (i32, i32) {
    %c0_i32 = arith.constant 0 : i32
    %c0_i32_0 = arith.constant 0 : i32
    %c0_i32_1 = arith.constant 0 : i32
    return %c0_i32, %c0_i32_0 : i32, i32
  }
  func.func @transform_7(%arg0: i32) -> (i32, i32) {
    %c0_i32 = arith.constant 0 : i32
    %c0_i32_0 = arith.constant 0 : i32
    %c0_i32_1 = arith.constant 0 : i32
    return %c0_i32, %c0_i32_0 : i32, i32
  }
  func.func @transform_8(%arg0: i32) -> (i32, i32) {
    %c0_i32 = arith.constant 0 : i32
    %c0_i32_0 = arith.constant 0 : i32
    %c0_i32_1 = arith.constant 0 : i32
    return %c0_i32, %c0_i32_0 : i32, i32
  }
  func.func @transform_9(%arg0: i32) -> (i32, i32) {
    %c0_i32 = arith.constant 0 : i32
    %c0_i32_0 = arith.constant 0 : i32
    %c0_i32_1 = arith.constant 0 : i32
    return %c0_i32, %c0_i32_0 : i32, i32
  }
  func.func @transform_10(%arg0: i32) -> (i32, i32) {
    %c0_i32 = arith.constant 0 : i32
    %c0_i32_0 = arith.constant 0 : i32
    %c0_i32_1 = arith.constant 0 : i32
    return %c0_i32, %c0_i32_0 : i32, i32
  }
  func.func @transform_11(%arg0: i32) -> (i32, i32) {
    %c0_i32 = arith.constant 0 : i32
    %c0_i32_0 = arith.constant 0 : i32
    %c0_i32_1 = arith.constant 0 : i32
    return %c0_i32, %c0_i32_0 : i32, i32
  }
  func.func @transform_12(%arg0: i32) -> (i32, i32) {
    %c0_i32 = arith.constant 0 : i32
    %c0_i32_0 = arith.constant 0 : i32
    %c0_i32_1 = arith.constant 0 : i32
    return %c0_i32, %c0_i32_0 : i32, i32
  }
  func.func @transform_13(%arg0: i32) -> (i32, i32) {
    %c0_i32 = arith.constant 0 : i32
    %c0_i32_0 = arith.constant 0 : i32
    %c0_i32_1 = arith.constant 0 : i32
    return %c0_i32, %c0_i32_0 : i32, i32
  }
  func.func @transform_14(%arg0: i32) -> (i32, i32) {
    %c0_i32 = arith.constant 0 : i32
    %c0_i32_0 = arith.constant 0 : i32
    %c0_i32_1 = arith.constant 0 : i32
    return %c0_i32, %c0_i32_0 : i32, i32
  }
  func.func @transform_15(%arg0: i32) -> (i32, i32) {
    %c0_i32 = arith.constant 0 : i32
    %c0_i32_0 = arith.constant 0 : i32
    %c0_i32_1 = arith.constant 0 : i32
    return %c0_i32, %c0_i32_0 : i32, i32
  }
  func.func @transform_16(%arg0: i32) -> (i32, i32) {
    %c0_i32 = arith.constant 0 : i32
    %c0_i32_0 = arith.constant 0 : i32
    %c0_i32_1 = arith.constant 0 : i32
    return %c0_i32, %c0_i32_0 : i32, i32
  }
  func.func @transform_17(%arg0: i32) -> (i32, i32) {
    %c0_i32 = arith.constant 0 : i32
    %c0_i32_0 = arith.constant 0 : i32
    %c0_i32_1 = arith.constant 0 : i32
    return %c0_i32, %c0_i32_0 : i32, i32
  }
  func.func @transform_18(%arg0: i32) -> (i32, i32) {
    %c0_i32 = arith.constant 0 : i32
    %c0_i32_0 = arith.constant 0 : i32
    %c0_i32_1 = arith.constant 0 : i32
    return %c0_i32, %c0_i32_0 : i32, i32
  }
  func.func @transform_19(%arg0: i32) -> (i32, i32, i32) {
    %c0_i32 = arith.constant 0 : i32
    %c0_i32_0 = arith.constant 0 : i32
    %c0_i32_1 = arith.constant 0 : i32
    return %arg0, %c0_i32, %c0_i32_0 : i32, i32, i32
  }
  func.func @transform_20(%arg0: i32) -> (i32, i32, i32, i32) {
    %c0_i32 = arith.constant 0 : i32
    %c0_i32_0 = arith.constant 0 : i32
    %c0_i32_1 = arith.constant 0 : i32
    %c0_i32_2 = arith.constant 0 : i32
    return %arg0, %c0_i32, %c0_i32_0, %c0_i32_1 : i32, i32, i32, i32
  }
}

</mosaic_0001>

<bundles_post_ra>
// kernel: tpu_custom_call.1
= control target key start
LH: loop header
LB: loop body
LE: loop exit
PB: predicated region body
PF: predicated region fallthrough
CT: control target
= control target key end

     0   :  { %s2182_s0 = inlined_call_operand.vmem [shape: f32[2,16,32], index: 0, kind: input, shape index: {}]   ;;  %s2183_s1 = inlined_call_operand.vmem [shape: f32[2,8,32], index: 1, kind: input, shape index: {}]   ;;  %s2184_s2 = inlined_call_operand.vmem [shape: f32[2,16,1], index: 2, kind: input, shape index: {}]   ;;  %s2185_s3 = inlined_call_operand.vmem [shape: f32[2,8,1], index: 3, kind: input, shape index: {}]   ;;  %s2186_s4 = inlined_call_operand.hbm [shape: s32[2,8,16], index: 4, kind: input, shape index: {}]   ;;  %s2187_s5 = inlined_call_operand.vmem [shape: f32[32,32], index: 5, kind: input, shape index: {}]   ;;  %s2188_s6 = inlined_call_operand.vmem [shape: f32[1,32], index: 6, kind: input, shape index: {}]   ;;  %s2189_s7 = inlined_call_operand.vmem [shape: f32[32,64], index: 7, kind: input, shape index: {}]   ;;  %s2190_s8 = inlined_call_operand.vmem [shape: f32[1,64], index: 8, kind: input, shape index: {}]   ;;  %s2191_s9 = inlined_call_operand.hbm [shape: f32[32,32], index: 9, kind: input, shape index: {}]   ;;  %s2192_s10 = inlined_call_operand.vmem [shape: f32[1,32], index: 10, kind: input, shape index: {}]   ;;  %s2193_s11 = inlined_call_operand.vmem [shape: f32[1,32], index: 11, kind: input, shape index: {}]   ;;  %s2194_s12 = inlined_call_operand.vmem [shape: f32[1,32], index: 12, kind: input, shape index: {}]   ;;  %s2195_s13 = inlined_call_operand.hbm [shape: f32[32,64], index: 13, kind: input, shape index: {}]   ;;  %s2196_s14 = inlined_call_operand.vmem [shape: f32[1,64], index: 14, kind: input, shape index: {}]   ;;  %s2197_s15 = inlined_call_operand.vmem [shape: f32[64,32], index: 15, kind: input, shape index: {}]   ;;  %s2198_s16 = inlined_call_operand.vmem [shape: f32[1,32], index: 16, kind: input, shape index: {}]   ;;  %s2199_s17 = inlined_call_operand.vmem [shape: f32[1,32], index: 17, kind: input, shape index: {}]   ;;  %s2200_s18 = inlined_call_operand.vmem [shape: f32[1,32], index: 18, kind: input, shape index: {}]   ;;  %s2201_s19 = inlined_call_operand.hbm [shape: f32[2,8,32], index: 19, kind: output, shape index: {0}]   ;;  %s2202_s20 = inlined_call_operand.hbm [shape: f32[2,2,8,16], index: 20, kind: output, shape index: {1}]  }
   0x1   :  { %2212 = sst [smem:[#allocation20_spill]] %s2182_s0 }
   0x2   :  { %2213 = sst [smem:[#allocation21_spill]] %s2183_s1 }
   0x3   :  { %2214 = sst [smem:[#allocation22_spill]] %s2184_s2 }
   0x4   :  { %2215 = sst [smem:[#allocation23_spill]] %s2185_s3 }
   0x5   :  { %2216 = sst [smem:[#allocation24_spill]] %s2186_s4 }
   0x6   :  { %2217 = sst [smem:[#allocation25_spill]] %s2187_s5 }
   0x7   :  { %2218 = sst [smem:[#allocation26_spill]] %s2189_s7 }
   0x8   :  { %2219 = sst [smem:[#allocation27_spill]] %s2191_s9 }
   0x9   :  { %2220 = sst [smem:[#allocation28_spill]] %s2195_s13 }
   0xa   :  { %2221 = sst [smem:[#allocation29_spill]] %s2199_s17 }
   0xb   :  { %2222 = sst [smem:[#allocation30_spill]] %s2200_s18 }
   0xc   :  { %2223 = sst [smem:[#allocation31_spill]] %s2201_s19 }
   0xd   :  { %2224 = sst [smem:[#allocation32_spill]] %s2202_s20 }
   0xe   :  { %26 = vsyncpa [#allocation3], 0 }
   0xf   :  { %28 = vsyncpa [#allocation3 + $0x1], 0 }
  0x10   :  { %29 = vsyncpa [#allocation6], 0 }
  0x11   :  { %30 = vsyncpa [#allocation4], 0 }
  0x12   :  { %32 = vsyncpa [#allocation4 + $0x1], 0 }
  0x13   :  { %33 = vsyncpa [#allocation10], 0 }
  0x14   :  { %35 = vsyncpa [#allocation10 + $0x1], 0  ;;  %s1868_s1 = smov 0   ;;  %s1870_s22 = smov 0  }
  0x15   :  { %s1872_s23 = smov 0   ;;  %s1874_s24 = smov 0  }
  0x16 LB: > { %2225 = sst [smem:[#allocation15_spill]] %s1737_s1  ;;  %s1892_s26 = sadd.s32 4294967295, %s1749_s24   ;;  %s1749_s24 = sphi %s1874_s24, %s2254_s24   ;;  %s1745_s23 = sphi %s1872_s23, %s2256_s23   ;;  %s1741_s22 = sphi %s1870_s22, %s2258_s22   ;;  %s1737_s1 = sphi %s1868_s1, %s2257_s1  }
  0x17   : > { %2226 = sst [smem:[#allocation16_spill]] %s1745_s23  ;;  %p1397_p0 = scmp.ge.s32.totalorder %s1749_s24, 1 }
  0x18   : > { %s2227_s9 = sld [smem:[#allocation27_spill]]  ;;  %p166_p1 = scmp.eq.s32.totalorder %s1892_s26, 0 }
  0x19   : > { %p522_p2 = scmp.lt.s32.totalorder %s1749_s24, 3  ;;  %s1751_s28 = smov [#allocation5]  }
  0x1a   : > { %s547_s4 = sshll.u32 %s1751_s28, 4  ;;  %s2229_s13 = sld [smem:[#allocation28_spill]]  ;;  %s548_s4 = int_to_ptr.vmem [resolvable:$true] %s547_s4 }
  0x1b   : > { %p1897_p3 = pnand %p1397_p0, %p522_p2  ;;  %s1752_s21 = smov [#allocation7]  }
  0x1c   : > { %s570_s2 = sshll.u32 %s1752_s21, 4  ;;  %s1753_s25 = smov 128   ;;  %s571_s2 = int_to_ptr.vmem [resolvable:$true] %s570_s2 }
  0x1d   : > { %p1454_p4 = pneg %p1897_p3  ;;  %s1754_s28 = smov 8  }
  0x1e   : > { %s545_s3 = sshll.u32 %s2227_s9, 4  ;;  %s1396_s29 = sadd.s32 4294967294, %s1749_s24   ;;  %s546_s3 = int_to_ptr.hbm [resolvable:$true] %s545_s3 }
  0x1f   : > { %p1455_p6 = pnand %p1454_p4, %p166_p1  ;;  %s1911_s30 = sadd.s32 1, %s1749_s24  }
  0x20   : > { %s568_s0 = sshll.u32 %s2229_s13, 4  ;;  %2230 = sst [smem:[#allocation17_spill]] %s1911_s30  ;;  %s569_s0 = int_to_ptr.hbm [resolvable:$true] %s568_s0 }
  0x21   : > { %1457 = dma.hbm_to_vmem [thread:$0]  (!%p1455_p6), %s546_s3, 512, %s548_s4, [#allocation6], %s1753_s25, %s1753_s25, %s1754_s28  }
  0x22   : > { %1460 = dma.hbm_to_vmem [thread:$0]  (!%p1455_p6), %s569_s0, 512, %s571_s2, [#allocation6], %s1753_s25, %s1753_s25, %s1754_s28  }
  0x23   : > { %s149_s9 = ssub.s32 %s1749_s24, %s1911_s30  ;;  %s152_s13 = sadd.s32 1, %s1745_s23 }
  0x24   : > { %p150_p7 = scmp.eq.s32.totalorder %s149_s9, 0  ;;  %p159_p8 = scmp.ne.s32.totalorder %s1745_s23, %s1741_s22 }
  0x25   : > { %p160_p9 = scmp.eq.s32.totalorder %s1749_s24, 0  ;;  %p165_p10 = scmp.ne.s32.totalorder %s1741_s22, %s1737_s1 }
  0x26   : > { %s1922_s21 = scalar_select %p150_p7, %s1745_s23, %s152_s13  }
  0x27   : > { %p1924_p11 = por %p160_p9, %p159_p8  ;;  %p1930_p12 = por %p166_p1, %p165_p10 }
  0x28   : > { %2231 = sst [smem:[#allocation18_spill]] %s1922_s21  ;;  %p483_p13 = scmp.eq.s32.totalorder %s1892_s26, 1 }
  0x29   : > { %p489_p0 = scmp.eq.s32.totalorder %s1396_s29, 1  ;;  %p1474_p2 = scmp.lt.s32.totalorder %s1749_s24, 2 }
  0x2a   : > { %s629_s4 = sand.u32 1, %s1745_s23   ;;  %p1937_p4 = por %p483_p13, %p159_p8 }
  0x2b   : > { %p1941_p6 = por %p489_p0, %p165_p10  ;;  %s1401_s0 = sshll.u32 %s629_s4, 3 }
  0x2c   : > { %s1402_s2 = sshll.u32 %s1749_s24, 3  ;;  %s2237_s21 = sld [smem:[#allocation24_spill]] }
  0x2d   : > { %s2235_s13 = scalar_select %p1941_p6, 1, 0 }
  0x2e   : > { %s633_s1 = scalar_lea.vmem [#allocation2], %s1401_s0  ;;  %p1951_p7 = pnand %p1474_p2, %p1924_p11 }
  0x2f   : > { %2236 = sst [smem:[#allocation19_spill]] %s2235_s13  ;;  %s641_s18 = sshll.u32 %s633_s1, 4  ;;  %s642_s18 = int_to_ptr.vmem [resolvable:$true] %s641_s18 }
  0x30   : > { %s630_s23 = scalar_lea.sflag [#allocation3], %s629_s4  ;;  %p1621_p9 = pneg %p1951_p7 }
  0x32   : > { %s637_s30 = scalar_lea.hbm %s2237_s21, %s1402_s2 }
  0x33   : > { %s639_s17 = sshll.u32 %s637_s30, 4  ;;  %s1624_s30 = scalar_lea.hbm %s2237_s21, 16  ;;  %s640_s17 = int_to_ptr.hbm [resolvable:$true] %s639_s17 }
  0x34   : > { %s1617_s20 = sshra.s32 %s640_s17, 4  ;;  %s1618_s20 = int_to_ptr.hbm [resolvable:$true] %s1617_s20 }
  0x35   : > { %s1619_s13 = scalar_lea.hbm %s1618_s20, 8  ;;  %p1625_p11 = scmp.lt.s32.totalorder %s1618_s20, %s2237_s21 }
  0x36   : > { %p1620_p8 = scmp.ne.s32.totalorder %s1618_s20, %s1619_s13  ;;  %p1626_p0 = scmp.lt.s32.totalorder %s1624_s30, %s1619_s13 }
  0x38   : > { %p1622_p10 = pnand %p1621_p9, %p1620_p8  ;;  %p1627_p2 = por %p1626_p0, %p1625_p11 }
  0x3a   : > { %p1623_p13 = pneg %p1622_p10 }
  0x3c   : > { %p1628_p5 = pnand %p1627_p2, %p1623_p13 }
  0x3e   : > { %1631 = shalt.err (!%p1628_p5)
}
  0x3f   : > { %1464 = dma.hbm_to_vmem [thread:$0]  (!%p1951_p7), %s640_s17, 128, %s642_s18, %s630_s23  }
  0x40   : > { %650 = sbr.rel (%p1897_p3) target bundleno = 2320 (0x910), region = 96  ;;  %s1968_s4 = sand.u32 (!%p1897_p3), 1, %s1741_s22  }
  0x41   : > { %s2211_s25 = sshll.u32 (!%p1897_p3), %s1968_s4, 3  ;;  %s653_s28 = scalar_lea.sflag (!%p1897_p3), [#allocation3], %s1968_s4 }
  0x42   : > { %s1974_s20 = scalar_lea.vmem (!%p1897_p3), [#allocation2], %s2211_s25 }
  0x45   : > { %1720 = dma.done.wait (%p1930_p12), %s653_s28, 128  }
  0x46   : > { %1722 = vsyncadd (%p1930_p12), %s653_s28, 4294967168 }
  0x47   : > { %1724 = dma.done.wait (%p166_p1), [#allocation6], 1024  }
  0x48   : > { %1726 = vsyncadd (%p166_p1), [#allocation6], 4294966272  ;;  %p747_p3 = scmp.lt.s32.totalorder %s1892_s26, 1  ;;  %v1755_v0 = vmov 0   ;;  %s2239_s3 = sld [smem:[#allocation22_spill]]  ;;  %vm793_vm0 = vcmask 261120  }
  0x49   : > { %1522 = vset.pattern.permute.xlu0 %v1755_v0  ;;  %1533 = vset.pattern.permute.xlu2 %v1755_v0  ;;  %s2240_s7 = sld [smem:[#allocation26_spill]]  ;;  %v1534_v18 = vld [vmem:[%s2190_s8] ss:$0 sm:$0xff]  ;;  %s1756_s30 = smov 112   ;;  %vm854_vm1 = vcmask 130048   ;;  %v1011_v62 = vld [vmem:[#allocation5 + $0x18] sm:$0xff] }
  0x4a   : > { %s1986_s17 = scalar_select %p747_p3, %s1892_s26, 1  ;;  %v1535_v23 = vld [vmem:[%s2188_s6] ss:$0 sm:$0xff]  ;;  %v1009_v0 = vld [vmem:[#allocation5 + $0x8] sm:$0xff]  ;;  %vm1129_vm7 = vcmask 523264  }
  0x4b   : > { %s2241_s5 = sld [smem:[#allocation25_spill]]  ;;  %v783_v32 = vld [vmem:[%s1974_s20] sm:$0xff]  ;;  %s1758_s20 = smov 80  }
  0x4c   : > { %s1437_s18 = sshll.u32 %s1986_s17, 4  ;;  %s1411_s27 = sshll.u32 %s1986_s17, 3  ;;  %vm784_vm2 = vcmp.ne.s32.totalorder %v783_v32, 0  ;;  %v1010_v63 = vld [vmem:[#allocation5 + $0x10] sm:$0xff] }
  0x4d   : > { %s2242_s28 = sld [smem:[#allocation21_spill]]  ;;  %s1408_s19 = sshll.u32 %s1968_s4, 4 }
  0x4e   : > { %s760_s13 = scalar_lea.vmem %s2239_s3, %s1437_s18  ;;  %s2243_s0 = sld [smem:[#allocation20_spill]] }
  0x4f   : > { %v768_v1 = vld [vmem:[%s760_s13] sm:$0xff]  ;;  %v820_v2 = vld [vmem:[%s2240_s7 + $0x18] sm:$0xff]  ;;  %v819_v3 = vld [vmem:[%s2240_s7 + $0x10] sm:$0xff]  ;;  %s1439_s3 = sshll.u32 %s1892_s26, 4  ;;  %s1194_s2 = scalar_lea.sflag [#allocation10], %s1968_s4 }
  0x50   : > { %772 = vperm.xlu0 %1522, %v768_v1   ;;  %843 = vmatpush.msra.mxu1 %v820_v2  ;;  %v818_v4 = vld [vmem:[%s2240_s7 + $0x8] sm:$0xff]  ;;  %v817_v6 = vld [vmem:[%s2240_s7] sm:$0xff]  ;;  %v1008_v1 = vld [vmem:[#allocation5] sm:$0xff]  ;;  %s2244_s7 = sld [smem:[#allocation23_spill]] }
  0x51   : > { %v769_v5 = vld [vmem:[%s760_s13 + $0x8] sm:$0xff]  ;;  %v788_v7 = vld [vmem:[%s2241_s5 + $0x18] sm:$0xff]  ;;  %v787_v8 = vld [vmem:[%s2241_s5 + $0x10] sm:$0xff]  ;;  %s1757_s13 = smov 96  }
  0x52   : > { %844 = vmatpush.msra.mxu1 %v819_v3  ;;  %809 = vmatpush.msra.mxu0 %v788_v7  ;;  %v786_v9 = vld [vmem:[%s2241_s5 + $0x8] sm:$0xff]  ;;  %v785_v10 = vld [vmem:[%s2241_s5] sm:$0xff] }
  0x53   : > { %s755_s23 = scalar_lea.vmem %s2242_s28, %s1411_s27  ;;  %s2050_s28 = scalar_lea.vmem [#allocation9], %s1408_s19 }
  0x54   : > { %845 = vmatpush.msra.mxu1 %v818_v4  ;;  %810 = vmatpush.msra.mxu0 %v787_v8  ;;  %v2022_v11 = vld [vmem:[%s755_s23] sm:$0xff]  ;;  %s751_s1 = scalar_lea.vmem %s2243_s0, %s1437_s18  ;;  %s1759_s23 = smov 16  }
  0x55   : > { %v766_v12 = vld [vmem:[%s751_s1] sm:$0xff]  ;;  %v767_v15 = vld [vmem:[%s751_s1 + $0x8] sm:$0xff]  ;;  %s2245_s1 = sld [smem:[#allocation32_spill]] }
  0x56   : > { %846 = vmatpush.msra.mxu1 %v817_v6  ;;  %811 = vmatpush.msra.mxu0 %v786_v9  ;;  %s764_s25 = scalar_lea.vmem %s2244_s7, %s1411_s27 }
  0x58   : > { %777 = vperm.xlu0 %1522, %v769_v5   ;;  %812 = vmatpush.msra.mxu0 %v785_v10  ;;  %v1536_v5 = vld [vmem:[%s2192_s10] ss:$0 sm:$0xff]  ;;  %v1760_v10 = vmov 32.0  }
  0x59   : > { %1415 = vmatmul.msk.f32.vlgmr.msra.gmra.mxu0 %vm793_vm0, %v2022_v11 }
  0x5b   : > { %s2246_s7 = smov %s2245_s1 }
  0x5c   : > { %s1667_s19 = scalar_lea.hbm %s2246_s7, 32 }
  0xc2   : > { %v773_v13 = vpop.permute.xlu0 %772 }
  0xc3   : > { %v780_v14 = vmul.f32 %v773_v13, %v766_v12 }
  0xc5   : > { %1416 = vmatmul.msk.f32.vlgmr.msra.gmra.mxu1 %vm793_vm0, %v780_v14 }
  0xca   : > { %v778_v16 = vpop.permute.xlu0 %777 }
  0xcb   : > { %v781_v17 = vmul.f32 %v778_v16, %v767_v15 }
  0xcd   : > { %1417 = vmatmul.msk.f32.gmra.mxu1 %vm793_vm0, %v781_v17 }
  0xd6   : > { %v814_v25 = vpop.f32.mrf.mxu0 }
  0xd7   : > { %v815_v26 = vadd.f32 %v1535_v23, %v814_v25  ;;  %v1088_v23 = vld [vmem:[#allocation7 + $0x18] sm:$0xff]  ;;  %v1086_v25 = vld [vmem:[#allocation7 + $0x8] sm:$0xff] }
 0x142   : > { %v848_v19 = vpop.f32.mrf.mxu1 }
 0x143   : > { %v849_v20 = vadd.f32 %v1534_v18, %v848_v19 }
 0x145   : > { %929 = vrot.lane.b32.xlu0 %v849_v20, %s1756_s30 }
 0x14a   : > { %v851_v21 = vpop.f32.mrf.mxu1 }
 0x14b   : > { %v852_v22 = vadd.f32 %v1534_v18, %v851_v21 }
 0x14d   : > { %1418 = vmatpush.xpose.msk.msra.mxu2 %vm854_vm1, %v852_v22  ;;  %v1523_v24 = vpack.i.bf16 %v849_v20, %v852_v22 }
 0x14f   : > { %1524 = vrot.lane.b32.xlu2 %v1523_v24, %s1757_s13 }
 0x151   : > { %1419 = vmatpush.xpose.msk.msra.mxu2 %vm854_vm1, %v849_v20 }
 0x154   : > { %1420 = vmatmul.msk.f32.vlgmr.msra.gmra.mxu2 %vm854_vm1, %v815_v26 }
 0x155   : > { %1031 = vmatpush.msrb.mxu2 %v1011_v62 }
 0x157   : > { %931 = vrot.lane.b32.xlu2 %v852_v22, %s1756_s30  ;;  %1032 = vmatpush.msrb.mxu2 %v1010_v63  ;;  %v782_v22 = vld [vmem:[%s764_s25] sm:$0xff]  ;;  %s1219_s25 = scalar_lea.hbm %s2245_s1, %s1439_s3 }
 0x158   : > { %s1222_s18 = sshll.u32 %s1219_s25, 4  ;;  %s1223_s18 = int_to_ptr.hbm [resolvable:$true] %s1222_s18 }
 0x159   : > { %1033 = vmatpush.msrb.mxu2 %v1009_v0  ;;  %s1661_s17 = sshra.s32 %s1223_s18, 4  ;;  %s1662_s17 = int_to_ptr.hbm [resolvable:$true] %s1661_s17 }
 0x15a   : > { %s1663_s27 = scalar_lea.hbm %s1662_s17, 16  ;;  %p1668_p7 = scmp.lt.s32.totalorder %s1662_s17, %s2246_s7 }
 0x15b   : > { %1034 = vmatpush.msrb.mxu2 %v1008_v1  ;;  %p1664_p1 = scmp.ne.s32.totalorder %s1662_s17, %s1663_s27  ;;  %p1669_p8 = scmp.lt.s32.totalorder %s1667_s19, %s1663_s27 }
 0x15d   : > { %p1665_p5 = pnand %p1664_p1, %p1937_p4  ;;  %p1670_p9 = por %p1669_p8, %p1668_p7 }
 0x15f   : > { %p1666_p12 = pneg %p1665_p5 }
 0x161   : > { %p1671_p10 = pnand %p1670_p9, %p1666_p12 }
 0x1a9   : > { %v1525_v27 = vpop.permute.xlu2 %1524 }
 0x1aa   : > { %v1526_v28 = vunpack.i.l.bf16 %v1525_v27  ;;  %v1527_v29 = vunpack.i.h.bf16 %v1525_v27  ;;  %v1124_v27 = vld [vmem:[%s2197_s15 + $0x38] sm:$0xff] }
 0x1ab   : > { %1141 = vmatpush.msrb.mxu1 %v1124_v27 }
 0x1ac   : > { %921 = vmatpush.msra.mxu3 %v1526_v28  ;;  %v1123_v28 = vld [vmem:[%s2197_s15 + $0x30] sm:$0xff] }
 0x1ad   : > { %1142 = vmatpush.msrb.mxu1 %v1123_v28 }
 0x1ae   : > { %922 = vmatpush.msra.mxu3 %v1527_v29 }
 0x1b1   : > { %v932_v30 = vpop.permute.xlu2 %931 }
 0x1b2   : > { %1422 = vmatpush.xpose.msk.msrb.mxu3 %vm854_vm1, %v932_v30 }
 0x1b7   : > { %v930_v31 = vpop.permute.xlu0 %929 }
 0x1b8   : > { %1423 = vmatpush.xpose.msk.msrb.mxu3 %vm854_vm1, %v930_v31  ;;  %v1122_v31 = vld [vmem:[%s2197_s15 + $0x28] sm:$0xff] }
 0x1b9   : > { %1143 = vmatpush.msrb.mxu1 %v1122_v31 }
 0x1d7   : > { %v881_v33 = vpop.f32.mrf.mxu2 }
 0x1d8   : > { %v884_v34 = vmul.f32 0.25, %v881_v33  ;;  %v1121_v33 = vld [vmem:[%s2197_s15 + $0x20] sm:$0xff] }
 0x1d9   : > { %1144 = vmatpush.msrb.mxu1 %v1121_v33 }
 0x1da   : > { %v885_v35 = vsel %vm784_vm2, -1e+30, %v884_v34  ;;  %v1120_v34 = vld [vmem:[%s2197_s15 + $0x18] sm:$0xff] }
 0x1db   : > { %v886_v36 = vsel %vm854_vm1, %v885_v35, -inf  ;;  %1145 = vmatpush.msrb.mxu1 %v1120_v34 }
 0x1dc   : > { %887 = vmax.xlane.f32.xlu1 %v886_v36 }
 0x24f   : > { %v888_v37 = vpop.xlane.xlu1 %887 }
 0x250   : > { %v889_v38 = vsub.f32 %v885_v35, %v888_v37  ;;  %v1119_v35 = vld [vmem:[%s2197_s15 + $0x10] sm:$0xff] }
 0x251   : > { %1146 = vmatpush.msrb.mxu1 %v1119_v35 }
 0x252   : > { %v890_v39 = vmul.f32 1.442695, %v889_v38 }
 0x254   : > { %1543 = vpow2.f32 %v890_v39 }
 0x25a   : > { %v1544_v40 = vpop.eup %1543 }
 0x25b   : > { %v892_v41 = vsel %vm854_vm1, %v1544_v40, 0.0 }
 0x25c   : > { %893 = vadd.xlane.f32.xlu1 %v892_v41 }
 0x275   : > { %927 = vrot.lane.b32.xlu1 %v815_v26, %s1756_s30  ;;  %v1085_v26 = vld [vmem:[#allocation7] sm:$0xff]  ;;  %s1220_s30 = sshll.u32 %s2050_s28, 4  ;;  %s1221_s30 = int_to_ptr.vmem [resolvable:$true] %s1220_s30 }
 0x27d   : > { %1529 = vrot.lane.b32.xlu1 %v1523_v24, %s1758_s20  ;;  %v1087_v24 = vld [vmem:[#allocation7 + $0x10] sm:$0xff] }
 0x2cf   : > { %v894_v42 = vpop.xlane.xlu1 %893 }
 0x2d0   : > { %1545 = vrcp.f32 %v894_v42  ;;  %v1537_v42 = vld [vmem:[%s2193_s11] ss:$0 sm:$0xff] }
 0x2d6   : > { %v1546_v43 = vpop.eup %1545 }
 0x2d7   : > { %v896_v44 = vmul.f32 %v1546_v43, %v1544_v40 }
 0x2d9   : > { %897 = vst.msk [vmem:[%s2050_s28] sm:$0xff] %vm854_vm1, %v896_v44  ;;  %1421 = vmatmul.msk.f32.vlgmr.msra.gmra.mxu3 %vm854_vm1, %v896_v44 }
 0x2da   : > { %1108 = vmatpush.msra.mxu3 %v1088_v23 }
 0x2dc   : > { %1109 = vmatpush.msra.mxu3 %v1087_v24 }
 0x2de   : > { %1110 = vmatpush.msra.mxu3 %v1086_v25 }
 0x2e0   : > { %1111 = vmatpush.msra.mxu3 %v1085_v26 }
 0x2e7   : > { %v928_v45 = vpop.permute.xlu1 %927 }
 0x2e8   : > { %1424 = vmatmul.msk.f32.vlgmr.msrb.gmra.mxu3 %vm854_vm1, %v928_v45  ;;  %v1538_v45 = vld [vmem:[%s2194_s12] ss:$0 sm:$0xff] }
 0x2ef   : > { %v1530_v46 = vpop.permute.xlu1 %1529 }
 0x2f0   : > { %v1531_v47 = vunpack.i.l.bf16 %v1530_v46  ;;  %v1532_v48 = vunpack.i.h.bf16 %v1530_v46 }
 0x2f2   : > { %997 = vmatpush.msrb.mxu0 %v1531_v47 }
 0x2f4   : > { %998 = vmatpush.msrb.mxu0 %v1532_v48 }
 0x35c   : > { %v924_v49 = vpop.f32.mrf.mxu3 }
 0x36b   : > { %v956_v50 = vpop.f32.mrf.mxu3 }
 0x36c   : > { %v959_v51 = vmul.f32 0.25, %v956_v50  ;;  %v1118_v50 = vld [vmem:[%s2197_s15 + $0x8] sm:$0xff] }
 0x36d   : > { %1147 = vmatpush.msrb.mxu1 %v1118_v50 }
 0x36e   : > { %v960_v52 = vsel %vm784_vm2, -1e+30, %v959_v51  ;;  %v1117_v51 = vld [vmem:[%s2197_s15] sm:$0xff] }
 0x36f   : > { %v961_v53 = vsel %vm854_vm1, %v960_v52, -inf  ;;  %1148 = vmatpush.msrb.mxu1 %v1117_v51 }
 0x370   : > { %962 = vmax.xlane.f32.xlu2 %v961_v53 }
 0x3e3   : > { %v963_v54 = vpop.xlane.xlu2 %962 }
 0x3e4   : > { %v964_v55 = vsub.f32 %v960_v52, %v963_v54  ;;  %v1539_v52 = vld [vmem:[%s2196_s14] ss:$0 sm:$0xff] }
 0x3e6   : > { %v965_v56 = vmul.f32 1.442695, %v964_v55 }
 0x3e8   : > { %1547 = vpow2.f32 %v965_v56  ;;  %v1540_v56 = vld [vmem:[%s2198_s16] ss:$0 sm:$0xff] }
 0x3ee   : > { %v1548_v57 = vpop.eup %1547 }
 0x3ef   : > { %v967_v58 = vsel %vm854_vm1, %v1548_v57, 0.0 }
 0x3f0   : > { %968 = vadd.xlane.f32.xlu0 %v967_v58 }
 0x463   : > { %v969_v59 = vpop.xlane.xlu0 %968 }
 0x464   : > { %1549 = vrcp.f32 %v969_v59 }
 0x465   : > { %1551 = vrcp.f32 %v1760_v10 }
 0x46a   : > { %v1550_v60 = vpop.eup %1549 }
 0x46b   : > { %v971_v61 = vmul.f32 %v1550_v60, %v1548_v57  ;;  %v1552_v12 = vpop.eup %1551 }
 0x46c   : > { %v1046_v13 = vmul.f32 32.0, %v1552_v12  ;;  %vm1050_vm3 = vweird.f32 %v1552_v12 }
 0x46d   : > { %1426 = vmatmul.msk.f32.vlgmr.msrb.gmra.mxu0 %vm854_vm1, %v971_v61  ;;  %1425 = vst.msk [vmem:[%s2050_s28 + $0x8] sm:$0xff] %vm854_vm1, %v971_v61 }
 0x46e   : > { %v1047_v14 = vsub.f32 1.0, %v1046_v13 }
 0x470   : > { %v1048_v15 = vmul.f32 %v1552_v12, %v1047_v14 }
 0x472   : > { %v1049_v16 = vadd.f32 %v1552_v12, %v1048_v15 }
 0x474   : > { %v2069_v17 = vsel %vm1050_vm3, %v1552_v12, %v1049_v16 }
 0x4ea   : > { %v1000_v2 = vpop.f32.mrf.mxu0 }
 0x4eb   : > { %1004 = vrot.lane.b32.xlu1 %v1000_v2, %s1759_s23 }
 0x55d   : > { %v1005_v3 = vpop.permute.xlu1 %1004 }
 0x55e   : > { %v1007_v4 = vsel %vm854_vm1, %v924_v49, %v1005_v3 }
 0x55f   : > { %1427 = vmatmul.msk.f32.vlgmr.msrb.gmra.mxu2 %vm793_vm0, %v1007_v4 }
 0x5e2   : > { %v1036_v6 = vpop.f32.mrf.mxu2 }
 0x5e3   : > { %v1037_v7 = vadd.f32 %v1536_v5, %v1036_v6 }
 0x5e5   : > { %v1039_v8 = vadd.f32 %v1037_v7, %v2022_v11 }
 0x5e7   : > { %v1042_v9 = vsel %vm793_vm0, %v1039_v8, 0.0 }
 0x5e8   : > { %1043 = vadd.xlane.f32.xlu1 %v1042_v9 }
 0x65b   : > { %v1044_v18 = vpop.xlane.xlu1 %1043 }
 0x65c   : > { %v1052_v19 = vmul.f32 %v2069_v17, %v1044_v18 }
 0x65e   : > { %v1053_v20 = vsub.f32 %v1039_v8, %v1052_v19 }
 0x660   : > { %v1054_v21 = vmul.f32 %v1053_v20, %v1053_v20 }
 0x662   : > { %v1055_v11 = vsel %vm793_vm0, %v1054_v21, 0.0 }
 0x663   : > { %1056 = vadd.xlane.f32.xlu2 %v1055_v11 }
 0x67b   : > { %1081 = vperm.xlu2 %1533, %v782_v22  }
 0x6d6   : > { %v1057_v29 = vpop.xlane.xlu2 %1056 }
 0x6d7   : > { %v1058_v30 = vmul.f32 %v1057_v29, %v2069_v17 }
 0x6d9   : > { %v1059_v32 = vadd.f32 1e-05, %v1058_v30 }
 0x6db   : > { %1553 = vrsqrt.f32 %v1059_v32  ;;  %vm1066_vm5 = vweird.f32 %v1059_v32 }
 0x6de   : > { %v2103_v47 = vpop.permute.xlu2 %1081 }
 0x6e1   : > { %v1554_v36 = vpop.eup %1553 }
 0x6e2   : > { %v1061_v37 = vmul.f32 %v1554_v36, %v1059_v32  ;;  %vm1067_vm4 = vweird.f32 %v1554_v36 }
 0x6e3   : > { %vm1068_vm6 = vmor %vm1066_vm5, %vm1067_vm4 }
 0x6e4   : > { %v1062_v38 = vmul.f32 %v1554_v36, %v1061_v37 }
 0x6e6   : > { %v1063_v39 = vmul.f32 0.5, %v1062_v38 }
 0x6e8   : > { %v1064_v40 = vsub.f32 1.5, %v1063_v39 }
 0x6ea   : > { %v1065_v41 = vmul.f32 %v1554_v36, %v1064_v40 }
 0x6ec   : > { %v1069_v43 = vsel %vm1068_vm6, %v1554_v36, %v1065_v41 }
 0x6ed   : > { %v1070_v44 = vmul.f32 %v1069_v43, %v1053_v20 }
 0x6ef   : > { %v1074_v46 = vmul.f32 %v1537_v42, %v1070_v44 }
 0x6f1   : > { %v1078_v48 = vadd.f32 %v1538_v45, %v1074_v46 }
 0x6f3   : > { %v1084_v49 = vmul.f32 %v2103_v47, %v1078_v48 }
 0x6f5   : > { %1428 = vmatmul.msk.f32.vlgmr.msra.gmra.mxu3 %vm793_vm0, %v1084_v49 }
 0x778   : > { %v1113_v53 = vpop.f32.mrf.mxu3 }
 0x779   : > { %v1114_v54 = vadd.f32 %v1539_v52, %v1113_v53 }
 0x77b   : > { %v1116_v55 = vmax.f32 %v1114_v54, 0.0 }
 0x77d   : > { %1429 = vmatmul.msk.f32.vlgmr.msrb.gmra.mxu1 %vm1129_vm7, %v1116_v55 }
 0x7fa   : > { %v1150_v57 = vpop.f32.mrf.mxu1 }
 0x7fb   : > { %v1151_v58 = vadd.f32 %v1540_v56, %v1150_v57 }
 0x7fd   : > { %v1153_v59 = vadd.f32 %v1151_v58, %v1084_v49 }
 0x7ff   : > { %v1156_v60 = vsel %vm793_vm0, %v1153_v59, 0.0 }
 0x800   : > { %1157 = vadd.xlane.f32.xlu0 %v1156_v60 }
 0x873   : > { %v1158_v61 = vpop.xlane.xlu0 %1157 }
 0x874   : > { %v1159_v62 = vmul.f32 %v1158_v61, %v2069_v17 }
 0x876   : > { %v1160_v63 = vsub.f32 %v1153_v59, %v1159_v62 }
 0x878   : > { %v1161_v0 = vmul.f32 %v1160_v63, %v1160_v63 }
 0x87a   : > { %v1162_v1 = vsel %vm793_vm0, %v1161_v0, 0.0 }
 0x87b   : > { %1163 = vadd.xlane.f32.xlu0 %v1162_v1 }
 0x87c   : > { %1674 = shalt.err (!%p1671_p10)
}
 0x87d   : > { %s1761_s28 = smov 128   ;;  %s1762_s3 = smov 8  }
 0x87e   : > { %1451 = dma.vmem_to_hbm [thread:$0]  (%p1937_p4), %s1221_s30, 256, %s1223_s18, %s1194_s2, %s1761_s28, %s1761_s28, %s1762_s3  }
 0x87f   : > { %s1432_s5 = sshll.u32 %s1892_s26, 3  ;;  %s2247_s1 = sld [smem:[#allocation29_spill]] }
 0x880   : > { %s2248_s18 = sld [smem:[#allocation30_spill]]  ;;  %s2250_s20 = sshll.u32 %s1968_s4, 3 }
 0x881   : > { %s2249_s27 = sld [smem:[#allocation31_spill]]  ;;  %s739_s26 = scalar_lea.vmem [#allocation8], %s2250_s20 }
 0x882   : > { %s1206_s19 = sshll.u32 %s739_s26, 4  ;;  %s1189_s28 = scalar_lea.sflag [#allocation4], %s1968_s4  ;;  %s1207_s19 = int_to_ptr.vmem [resolvable:$true] %s1206_s19 }
 0x885   : > { %v1541_v12 = vld [vmem:[%s2247_s1] ss:$0 sm:$0xff] }
 0x886   : > { %v1542_v14 = vld [vmem:[%s2248_s18] ss:$0 sm:$0xff] }
 0x887   : > { %s1204_s13 = scalar_lea.hbm %s2249_s27, %s1432_s5  ;;  %s1695_s1 = scalar_lea.hbm %s2249_s27, 16 }
 0x888   : > { %s1208_s23 = sshll.u32 %s1204_s13, 4  ;;  %s1209_s23 = int_to_ptr.hbm [resolvable:$true] %s1208_s23 }
 0x889   : > { %s1689_s3 = sshra.s32 %s1209_s23, 4  ;;  %s1690_s3 = int_to_ptr.hbm [resolvable:$true] %s1689_s3 }
 0x88a   : > { %s1691_s29 = scalar_lea.hbm %s1690_s3, 8  ;;  %p1696_p2 = scmp.lt.s32.totalorder %s1690_s3, %s2249_s27 }
 0x88b   : > { %p1692_p13 = scmp.ne.s32.totalorder %s1690_s3, %s1691_s29  ;;  %p1697_p3 = scmp.lt.s32.totalorder %s1695_s1, %s1691_s29 }
 0x88d   : > { %p1693_p11 = pnand %p1692_p13, %p1937_p4  ;;  %p1698_p1 = por %p1697_p3, %p1696_p2 }
 0x88f   : > { %p1694_p0 = pneg %p1693_p11 }
 0x891   : > { %p1699_p5 = pnand %p1698_p1, %p1694_p0 }
 0x8ee   : > { %v1164_v2 = vpop.xlane.xlu0 %1163 }
 0x8ef   : > { %v1165_v3 = vmul.f32 %v1164_v2, %v2069_v17 }
 0x8f1   : > { %v1166_v4 = vadd.f32 1e-05, %v1165_v3 }
 0x8f3   : > { %1555 = vrsqrt.f32 %v1166_v4  ;;  %vm1173_vm9 = vweird.f32 %v1166_v4 }
 0x8f9   : > { %v1556_v5 = vpop.eup %1555 }
 0x8fa   : > { %v1168_v6 = vmul.f32 %v1556_v5, %v1166_v4  ;;  %vm1174_vm8 = vweird.f32 %v1556_v5 }
 0x8fb   : > { %vm1175_vm10 = vmor %vm1173_vm9, %vm1174_vm8 }
 0x8fc   : > { %v1169_v7 = vmul.f32 %v1556_v5, %v1168_v6 }
 0x8fe   : > { %v1170_v8 = vmul.f32 0.5, %v1169_v7 }
 0x900   : > { %v1171_v9 = vsub.f32 1.5, %v1170_v8 }
 0x902   : > { %v1172_v10 = vmul.f32 %v1556_v5, %v1171_v9 }
 0x904   : > { %v1176_v13 = vsel %vm1175_vm10, %v1556_v5, %v1172_v10 }
 0x905   : > { %v1177_v15 = vmul.f32 %v1176_v13, %v1160_v63 }
 0x907   : > { %v1181_v16 = vmul.f32 %v1541_v12, %v1177_v15 }
 0x909   : > { %v1185_v17 = vadd.f32 %v1542_v14, %v1181_v16 }
 0x90b   : > { %v1186_v18 = vmul.f32 %v1185_v17, %v2103_v47 }
 0x90d   : > { %1187 = vst.msk [vmem:[%s739_s26] sm:$0xff] %vm793_vm0, %v1186_v18 }
 0x90e   : > { %1702 = shalt.err (!%p1699_p5)
}
 0x90f   : > { %1450 = dma.vmem_to_hbm [thread:$0]  (%p1937_p4), %s1207_s19, 128, %s1209_s23, %s1189_s28  }
 0x910 PF: > { %s2251_s4 = sld [smem:[#allocation15_spill]]  ;;  %p2253_p12 = scmp.ge.s32.totalorder %s1749_s24, 2 }
 0x912   : > { %p1466_p7 = pnand %p2253_p12, %p1941_p6 }
 0x914   : > { %p1467_p8 = pneg %p1466_p7 }
 0x916   : > { %s1237_s2 = sand.u32 1, %s2251_s4  }
 0x917   : > { %s1238_s17 = scalar_lea.sflag [#allocation4], %s1237_s2 }
 0x918   : > { %1728 = dma.done.wait (%p1467_p8), %s1238_s17, 128  }
 0x919   : > { %1730 = vsyncadd (%p1467_p8), %s1238_s17, 4294967168  ;;  %s1248_s13 = scalar_lea.sflag [#allocation10], %s1237_s2 }
 0x91a   : > { %1732 = dma.done.wait (%p1467_p8), %s1248_s13, 256  }
 0x91b   : > { %1734 = vsyncadd (%p1467_p8), %s1248_s13, 4294967040  ;;  %s2254_s24 = sld [smem:[#allocation17_spill]]  ;;  %s2257_s1 = smov %s1741_s22 }
 0x91c   : > { %s2255_s20 = sld [smem:[#allocation16_spill]] }
 0x91d   : > { %s2256_s23 = sld [smem:[#allocation18_spill]] }
 0x921   : > { %p38_p4 = scmp.ge.s32.totalorder %s2254_s24, 4  }
 0x922   : > { %s2258_s22 = smov %s2255_s20 }
 0x923   :  { %40 = sbr.rel (!%p38_p4) target bundleno = 22 (0x16), region = 179 }
 0x928   :  { %1254 = vsyncpa [#allocation3], 1 }
 0x929   :  { %1256 = vsyncpa [#allocation3 + $0x1], 1 }
 0x92a   :  { %1257 = vsyncpa [#allocation6], 1 }
 0x92b   :  { %1258 = vsyncpa [#allocation4], 1 }
 0x92c   :  { %1260 = vsyncpa [#allocation4 + $0x1], 1 }
 0x92d   :  { %1261 = vsyncpa [#allocation10], 1 }
 0x92e   :  { %1263 = vsyncpa [#allocation10 + $0x1], 1 }

</bundles_post_ra>
